<compile_context>
chip_gen: v7x
topology: tpu7x:2x2x1
jax: 0.10.0
libtpu: 0.0.40
codegen_flags: <defaults>
</compile_context>

<pallas_src>
import jax
import jax.numpy as jnp
from jax.experimental import pallas as pl
from jax.experimental.pallas import tpu as pltpu

ENCODING_DIMS = 32
IN_DIM = 28 * 28  # 784


def _round_up(x, m):
    return ((x + m - 1) // m) * m


def _autoencoder_kernel(x_ref, we_ref, be_ref, wd_ref, bd_ref, o_ref):
    """Fused encoder->relu->decoder->sigmoid for one batch tile.

    x_ref : (TB, 784)   input tile            (io dtype, e.g. bf16)
    we_ref: (784, 32)   encoder weight (in, out) layout
    be_ref: (1, 32)     encoder bias (f32)
    wd_ref: (32, 784)   decoder weight (in, out) layout
    bd_ref: (1, 784)    decoder bias (f32)
    o_ref : (TB, 784)   output tile
    """
    x = x_ref[...]

    # Encoder: (TB, 784) @ (784, 32) -> (TB, 32) with f32 accumulation, ReLU.
    h = jnp.dot(x, we_ref[...], preferred_element_type=jnp.float32)
    h = jnp.maximum(h + be_ref[...], 0.0)

    # Decoder: (TB, 32) @ (32, 784) -> (TB, 784) with f32 accumulation.
    y = jnp.dot(h.astype(wd_ref.dtype), wd_ref[...],
                preferred_element_type=jnp.float32)
    y = y + bd_ref[...]

    # Sigmoid = 1 / (1 + exp(-y)); exp on the EUP, approx reciprocal stays in
    # the EUP slot instead of an exact VALU divide.
    e = jnp.exp(-y)
    s = pl.reciprocal(1.0 + e, approx=True)
    o_ref[...] = s.astype(o_ref.dtype)


def linear_autoencoder(x, w_enc, b_enc, w_dec, b_dec, *,
                       batch_tile=512,
                       io_dtype=jnp.bfloat16,
                       out_dtype=None):
    """x: (B, 784). Weights in (in, out) layout. Returns (B, 784) in out_dtype.

    io_dtype controls the dtype of x / weights / output moved through HBM;
    accumulation is always f32. Use io_dtype=jnp.float32 for exact f32.
    """
    B, D = x.shape
    assert D == IN_DIM
    if out_dtype is None:
        out_dtype = io_dtype

    # --- dtype handling (bf16 I/O by default; biases stay f32, they're tiny).
    x = x.astype(io_dtype)
    we = w_enc.astype(io_dtype)
    wd = w_dec.astype(io_dtype)
    be = b_enc.reshape(1, -1).astype(jnp.float32)
    bd = b_dec.reshape(1, -1).astype(jnp.float32)

    # --- tile-size selection (multiple of 8 sublanes; clamp to the batch).
    tb = min(batch_tile, _round_up(B, 8))
    tb = _round_up(tb, 8)
    # Prefer >=2 grid steps when the batch is large enough (v7x dual TC).
    if _round_up(B, tb) // tb < 2 and B >= 512:
        tb = _round_up((B + 1) // 2, 128)

    B_pad = _round_up(B, tb)
    if B_pad != B:
        x = jnp.pad(x, ((0, B_pad - B), (0, 0)))

    grid = (B_pad // tb,)

    # --- scoped-VMEM budget: double-buffered x + out tiles, plus params.
    io_bytes = jnp.dtype(io_dtype).itemsize
    ob = jnp.dtype(out_dtype).itemsize
    tile_bytes = 2 * tb * IN_DIM * (io_bytes + ob)           # 2-deep pipeline
    param_bytes = 2 * (2 * IN_DIM * ENCODING_DIMS * io_bytes
                       + (IN_DIM + ENCODING_DIMS) * 4)
    vmem_limit = int(min(max(tile_bytes + param_bytes + (4 << 20), 16 << 20),
                         64 << 20))

    out = pl.pallas_call(
        _autoencoder_kernel,
        out_shape=jax.ShapeDtypeStruct((B_pad, IN_DIM), out_dtype),
        grid_spec=pltpu.PrefetchScalarGridSpec(
            num_scalar_prefetch=0,
            grid=grid,
            in_specs=[
                # batch tile of x
                pl.BlockSpec((tb, IN_DIM), lambda i: (i, 0)),
                # parameters: full arrays, constant block index -> stay
                # resident in VMEM across the whole grid (no re-DMA).
                pl.BlockSpec((IN_DIM, ENCODING_DIMS), lambda i: (0, 0)),
                pl.BlockSpec((1, ENCODING_DIMS), lambda i: (0, 0)),
                pl.BlockSpec((ENCODING_DIMS, IN_DIM), lambda i: (0, 0)),
                pl.BlockSpec((1, IN_DIM), lambda i: (0, 0)),
            ],
            out_specs=pl.BlockSpec((tb, IN_DIM), lambda i: (i, 0)),
        ),
        compiler_params=pltpu.CompilerParams(
            dimension_semantics=("parallel",),
            vmem_limit_bytes=vmem_limit,
        ),
    )(x, we, be, wd, bd)

    if B_pad != B:
        out = out[:B]
    return out


def init_params(key):
    """Mimics PyTorch nn.Linear default init: U(-1/sqrt(fan_in), 1/sqrt(fan_in))."""
    k1, k2, k3, k4 = jax.random.split(key, 4)
    bound_e = 1.0 / (IN_DIM ** 0.5)
    bound_d = 1.0 / (ENCODING_DIMS ** 0.5)
    # stored as (in_features, out_features) -- i.e. transpose of PyTorch layout
    w_enc = jax.random.uniform(k1, (IN_DIM, ENCODING_DIMS), jnp.float32,
                               minval=-bound_e, maxval=bound_e)
    b_enc = jax.random.uniform(k2, (ENCODING_DIMS,), jnp.float32,
                               minval=-bound_e, maxval=bound_e)
    w_dec = jax.random.uniform(k3, (ENCODING_DIMS, IN_DIM), jnp.float32,
                               minval=-bound_d, maxval=bound_d)
    b_dec = jax.random.uniform(k4, (IN_DIM,), jnp.float32,
                               minval=-bound_d, maxval=bound_d)
    return w_enc, b_enc, w_dec, b_dec


if __name__ == "__main__":
    key = jax.random.PRNGKey(0)
    k_params, k_x = jax.random.split(key)

    w_enc, b_enc, w_dec, b_dec = init_params(k_params)

    # Small batch; 4 is deliberately not a multiple of 8 to exercise the
    # ragged-batch padding path.
    batch = 4
    x = jax.random.uniform(k_x, (batch, IN_DIM), jnp.float32)  # MNIST-like in [0,1)

    # --- default bf16-I/O path ------------------------------------------------
    out_bf16 = linear_autoencoder(x, w_enc, b_enc, w_dec, b_dec)
    out_bf16 = jax.block_until_ready(out_bf16).astype(jnp.float32)
    assert out_bf16.shape == (batch, IN_DIM)

    # Reference using the same bf16-quantized inputs (f32 math).
    xq = x.astype(jnp.bfloat16).astype(jnp.float32)
    weq = w_enc.astype(jnp.bfloat16).astype(jnp.float32)
    wdq = w_dec.astype(jnp.bfloat16).astype(jnp.float32)
    h_ref = jnp.maximum(xq @ weq + b_enc, 0.0)
    y_ref = jax.nn.sigmoid(h_ref @ wdq + b_dec)
    assert jnp.allclose(out_bf16, y_ref, atol=1e-2, rtol=1e-2)

    # --- exact f32 path -------------------------------------------------------
    out_f32 = linear_autoencoder(x, w_enc, b_enc, w_dec, b_dec,
                                 io_dtype=jnp.float32)
    out_f32 = jax.block_until_ready(out_f32)
    h_ref = jnp.maximum(x @ w_enc + b_enc, 0.0)
    y_ref = jax.nn.sigmoid(h_ref @ w_dec + b_dec)
    assert out_f32.shape == (batch, IN_DIM)
    assert jnp.allclose(out_f32, y_ref, atol=5e-3, rtol=5e-3)

    print("KERNEL_OK")
</pallas_src>

<mosaic_0001>
module attributes {stable_mosaic.version = 11 : i64} {
  func.func @_autoencoder_kernel(%arg0: i32, %arg1: memref<8x784xbf16, #tpu.memory_space<vmem>>, %arg2: memref<784x32xbf16, #tpu.memory_space<vmem>>, %arg3: memref<1x32xf32, #tpu.memory_space<vmem>>, %arg4: memref<32x784xbf16, #tpu.memory_space<vmem>>, %arg5: memref<1x784xf32, #tpu.memory_space<vmem>>, %arg6: memref<8x784xbf16, #tpu.memory_space<vmem>>) attributes {dimension_semantics = [#tpu.dimension_semantics<parallel>], iteration_bounds = array<i64: 1>, scalar_prefetch = 0 : i64, scratch_operands = 0 : i64, tpu.core_type = #tpu.core_type<tc>, window_params = [{transform_indices = @transform_0, window_bounds = array<i64: 8, 784>}, {pipeline_mode = #tpu.pipeline_mode<synchronous>, transform_indices = @transform_1, window_bounds = array<i64: 784, 32>}, {pipeline_mode = #tpu.pipeline_mode<synchronous>, transform_indices = @transform_2, window_bounds = array<i64: 1, 32>}, {pipeline_mode = #tpu.pipeline_mode<synchronous>, transform_indices = @transform_3, window_bounds = array<i64: 32, 784>}, {pipeline_mode = #tpu.pipeline_mode<synchronous>, transform_indices = @transform_4, window_bounds = array<i64: 1, 784>}, {transform_indices = @transform_5, window_bounds = array<i64: 8, 784>}]} {
    %c0 = arith.constant 0 : index
    %c0_0 = arith.constant 0 : index
    %0 = vector.load %arg1[%c0, %c0_0] : memref<8x784xbf16, #tpu.memory_space<vmem>>, vector<8x784xbf16>
    %c0_1 = arith.constant 0 : index
    %c0_2 = arith.constant 0 : index
    %1 = vector.load %arg2[%c0_1, %c0_2] : memref<784x32xbf16, #tpu.memory_space<vmem>>, vector<784x32xbf16>
    %cst = arith.constant dense<0.000000e+00> : vector<8x32xf32>
    %2 = tpu.matmul %0, %1, %cst {dimension_numbers = #tpu.dot_dimension_numbers<[1], [0], [0], [1], [0, 0, 1, 1], [], []>} : vector<8x784xbf16>, vector<784x32xbf16>, vector<8x32xf32> -> vector<8x32xf32>
    %c0_3 = arith.constant 0 : index
    %c0_4 = arith.constant 0 : index
    %3 = vector.load %arg3[%c0_3, %c0_4] : memref<1x32xf32, #tpu.memory_space<vmem>>, vector<1x32xf32>
    %4 = vector.broadcast %3 : vector<1x32xf32> to vector<8x32xf32>
    %5 = arith.addf %2, %4 : vector<8x32xf32>
    %cst_5 = arith.constant 0.000000e+00 : f32
    %6 = vector.broadcast %cst_5 : f32 to vector<8x32xf32>
    %7 = arith.maximumf %5, %6 : vector<8x32xf32>
    %8 = arith.truncf %7 : vector<8x32xf32> to vector<8x32xbf16>
    %c0_6 = arith.constant 0 : index
    %c0_7 = arith.constant 0 : index
    %9 = vector.load %arg4[%c0_6, %c0_7] : memref<32x784xbf16, #tpu.memory_space<vmem>>, vector<32x784xbf16>
    %cst_8 = arith.constant dense<0.000000e+00> : vector<8x784xf32>
    %10 = tpu.matmul %8, %9, %cst_8 {dimension_numbers = #tpu.dot_dimension_numbers<[1], [0], [0], [1], [0, 0, 1, 1], [], []>} : vector<8x32xbf16>, vector<32x784xbf16>, vector<8x784xf32> -> vector<8x784xf32>
    %c0_9 = arith.constant 0 : index
    %c0_10 = arith.constant 0 : index
    %11 = vector.load %arg5[%c0_9, %c0_10] : memref<1x784xf32, #tpu.memory_space<vmem>>, vector<1x784xf32>
    %12 = vector.broadcast %11 : vector<1x784xf32> to vector<8x784xf32>
    %13 = arith.addf %10, %12 : vector<8x784xf32>
    %cst_11 = arith.constant 0.000000e+00 : f32
    %14 = vector.broadcast %cst_11 : f32 to vector<8x784xf32>
    %15 = arith.subf %14, %13 : vector<8x784xf32>
    %16 = math.exp %15 : vector<8x784xf32>
    %cst_12 = arith.constant 1.000000e+00 : f32
    %17 = vector.broadcast %cst_12 : f32 to vector<8x784xf32>
    %18 = arith.addf %17, %16 : vector<8x784xf32>
    %19 = tpu.reciprocal %18 {approx = true} : vector<8x784xf32> -> vector<8x784xf32>
    %20 = arith.truncf %19 : vector<8x784xf32> to vector<8x784xbf16>
    %c0_13 = arith.constant 0 : index
    %c0_14 = arith.constant 0 : index
    %21 = vector.load %arg6[%c0_13, %c0_14] : memref<8x784xbf16, #tpu.memory_space<vmem>>, vector<8x784xbf16>
    tpu.vector_store %arg6[%c0_13, %c0_14], %20 {strides = array<i32>} : memref<8x784xbf16, #tpu.memory_space<vmem>>, vector<8x784xbf16>,
    return
  }
  func.func @transform_0(%arg0: i32) -> (i32, i32) {
    %c0_i32 = arith.constant 0 : i32
    %c0_i32_0 = arith.constant 0 : i32
    return %arg0, %c0_i32 : i32, i32
  }
  func.func @transform_1(%arg0: i32) -> (i32, i32) {
    %c0_i32 = arith.constant 0 : i32
    %c0_i32_0 = arith.constant 0 : i32
    %c0_i32_1 = arith.constant 0 : i32
    return %c0_i32, %c0_i32_0 : i32, i32
  }
  func.func @transform_2(%arg0: i32) -> (i32, i32) {
    %c0_i32 = arith.constant 0 : i32
    %c0_i32_0 = arith.constant 0 : i32
    %c0_i32_1 = arith.constant 0 : i32
    return %c0_i32, %c0_i32_0 : i32, i32
  }
  func.func @transform_3(%arg0: i32) -> (i32, i32) {
    %c0_i32 = arith.constant 0 : i32
    %c0_i32_0 = arith.constant 0 : i32
    %c0_i32_1 = arith.constant 0 : i32
    return %c0_i32, %c0_i32_0 : i32, i32
  }
  func.func @transform_4(%arg0: i32) -> (i32, i32) {
    %c0_i32 = arith.constant 0 : i32
    %c0_i32_0 = arith.constant 0 : i32
    %c0_i32_1 = arith.constant 0 : i32
    return %c0_i32, %c0_i32_0 : i32, i32
  }
  func.func @transform_5(%arg0: i32) -> (i32, i32) {
    %c0_i32 = arith.constant 0 : i32
    %c0_i32_0 = arith.constant 0 : i32
    return %arg0, %c0_i32 : i32, i32
  }
}

</mosaic_0001>

<bundles_post_ra>
// kernel: tpu_custom_call.1
= control target key start
LH: loop header
LB: loop body
LE: loop exit
PB: predicated region body
PF: predicated region fallthrough
CT: control target
= control target key end

     0   :  { %v1291_v43 = vmov 0.0   ;;  %vm1292_vm0 = vmmov 0   ;;  %vm449_vm1 = vcmask 130048   ;;  %s1550_s0 = inlined_call_operand.vmem [shape: bf16[8,784], index: 0, kind: input, shape index: {}]   ;;  %s1551_s1 = inlined_call_operand.vmem [shape: bf16[784,32], index: 1, kind: input, shape index: {}]   ;;  %s1552_s2 = inlined_call_operand.vmem [shape: f32[1,32], index: 2, kind: input, shape index: {}]   ;;  %s1553_s3 = inlined_call_operand.vmem [shape: bf16[32,784], index: 3, kind: input, shape index: {}]   ;;  %s1554_s4 = inlined_call_operand.vmem [shape: f32[1,784], index: 4, kind: input, shape index: {}]   ;;  %s1555_s5 = inlined_call_operand.hbm [shape: bf16[8,784], index: 5, kind: output, shape index: {}]  }
   0x1   :  { %v1163_v0 = vld [vmem:[%s1551_s1 + $0x40] sm:$0xff]   ;;  %v1167_v4 = vld [vmem:[%s1551_s1 + $0x48] sm:$0xff]   ;;  %v1171_v8 = vld [vmem:[%s1551_s1 + $0x50] sm:$0xff]  }
   0x2   :  { %v1164_v1 = vld [vmem:[%s1551_s1] sm:$0xff]   ;;  %1074 = vmatprep.subr.bf16.mxu0 %v1163_v0  ;;  %v1168_v5 = vld [vmem:[%s1551_s1 + $0x8] sm:$0xff]   ;;  %v1172_v9 = vld [vmem:[%s1551_s1 + $0x10] sm:$0xff]  }
   0x3   :  { %v1165_v2 = vld [vmem:[%s1551_s1 + $0xc0] sm:$0xff]   ;;  %1075 = vmatpush3.bf16.msra.mxu0 %v1164_v1  ;;  %v1169_v6 = vld [vmem:[%s1551_s1 + $0xc8] sm:$0xff]   ;;  %v1173_v10 = vld [vmem:[%s1551_s1 + $0xd0] sm:$0xff]  }
   0x4   :  { %v1166_v3 = vld [vmem:[%s1551_s1 + $0x80] sm:$0xff]   ;;  %1096 = vmatprep.subr.bf16.mxu1 %v1165_v2  ;;  %1076 = vmatprep.subr.bf16.mxu0 %v1167_v4  ;;  %v1170_v7 = vld [vmem:[%s1551_s1 + $0x88] sm:$0xff]   ;;  %v1174_v11 = vld [vmem:[%s1551_s1 + $0x90] sm:$0xff]  }
   0x5   :  { %1097 = vmatpush3.bf16.msra.mxu1 %v1166_v3  ;;  %v1175_v12 = vld [vmem:[%s1551_s1 + $0x58] sm:$0xff]   ;;  %v1179_v16 = vld [vmem:[%s1551_s1 + $0x60] sm:$0xff]   ;;  %v1183_v20 = vld [vmem:[%s1551_s1 + $0x68] sm:$0xff]  }
   0x6   :  { %1098 = vmatprep.subr.bf16.mxu1 %v1169_v6  ;;  %v1176_v13 = vld [vmem:[%s1551_s1 + $0x18] sm:$0xff]   ;;  %v1180_v17 = vld [vmem:[%s1551_s1 + $0x20] sm:$0xff]   ;;  %v1184_v21 = vld [vmem:[%s1551_s1 + $0x28] sm:$0xff]  }
   0x7   :  { %1077 = vmatpush3.bf16.msra.mxu0 %v1168_v5  ;;  %v1177_v14 = vld [vmem:[%s1551_s1 + $0xd8] sm:$0xff]   ;;  %v1181_v18 = vld [vmem:[%s1551_s1 + $0xe0] sm:$0xff]   ;;  %v1185_v22 = vld [vmem:[%s1551_s1 + $0xe8] sm:$0xff]  }
   0x8   :  { %1078 = vmatprep.subr.bf16.mxu0 %v1171_v8  ;;  %v1178_v15 = vld [vmem:[%s1551_s1 + $0x98] sm:$0xff]   ;;  %v1182_v19 = vld [vmem:[%s1551_s1 + $0xa0] sm:$0xff]   ;;  %v1186_v23 = vld [vmem:[%s1551_s1 + $0xa8] sm:$0xff]  }
   0x9   :  { %1099 = vmatpush3.bf16.msra.mxu1 %v1170_v7  ;;  %v1187_v24 = vld [vmem:[%s1551_s1 + $0x70] sm:$0xff]   ;;  %v1191_v28 = vld [vmem:[%s1551_s1 + $0x78] sm:$0xff]   ;;  %v22_v31 = vld [vmem:[%s1550_s0] sm:$0xff] }
   0xa   :  { %1100 = vmatprep.subr.bf16.mxu1 %v1173_v10  ;;  %v1188_v25 = vld [vmem:[%s1551_s1 + $0x30] sm:$0xff]   ;;  %v1192_v29 = vld [vmem:[%s1551_s1 + $0x38] sm:$0xff]   ;;  %v991_v32 = vcombine.low %v22_v31, %v22_v31  ;;  %v992_v33 = vcombine.high %v22_v31, %v22_v31  ;;  %v1197_v35 = vld [vmem:[%s1551_s1 + $0x140] sm:$0xff]  }
   0xb   :  { %1079 = vmatpush3.bf16.msra.mxu0 %v1172_v9  ;;  %v1189_v26 = vld [vmem:[%s1551_s1 + $0xf0] sm:$0xff]   ;;  %v1193_v30 = vld [vmem:[%s1551_s1 + $0xf8] sm:$0xff]   ;;  %v23_v36 = vld [vmem:[%s1550_s0 + $0x8] sm:$0xff] }
   0xc   :  { %1080 = vmatprep.subr.bf16.mxu0 %v1175_v12  ;;  %v1190_v27 = vld [vmem:[%s1551_s1 + $0xb0] sm:$0xff]   ;;  %v1196_v34 = vld [vmem:[%s1551_s1 + $0xb8] sm:$0xff]   ;;  %485 = vmatprep.mubr.bf16.mxu0 %v992_v33  ;;  %v993_v37 = vcombine.low %v23_v36, %v23_v36  ;;  %v994_v38 = vcombine.high %v23_v36, %v23_v36  ;;  %v1200_v39 = vld [vmem:[%s1551_s1 + $0x100] sm:$0xff]  }
   0xd   :  { %1101 = vmatpush3.bf16.msra.mxu1 %v1174_v11  ;;  %v1201_v40 = vld [vmem:[%s1551_s1 + $0x148] sm:$0xff]   ;;  %v1203_v42 = vld [vmem:[%s1551_s1 + $0x150] sm:$0xff]   ;;  %v1205_v45 = vld [vmem:[%s1551_s1 + $0x158] sm:$0xff]  }
   0xe   :  { %1102 = vmatprep.subr.bf16.mxu1 %v1177_v14  ;;  %525 = vmatprep.mubr.bf16.mxu1 %v994_v38  ;;  %v1202_v41 = vld [vmem:[%s1551_s1 + $0x108] sm:$0xff]   ;;  %v1204_v44 = vld [vmem:[%s1551_s1 + $0x110] sm:$0xff]   ;;  %v1206_v46 = vld [vmem:[%s1551_s1 + $0x118] sm:$0xff]  }
   0xf   :  { %1081 = vmatpush3.bf16.msra.mxu0 %v1176_v13  ;;  %v1207_v47 = vld [vmem:[%s1551_s1 + $0x160] sm:$0xff]   ;;  %v1209_v49 = vld [vmem:[%s1551_s1 + $0x168] sm:$0xff]   ;;  %v24_v51 = vld [vmem:[%s1550_s0 + $0x10] sm:$0xff] }
  0x10   :  { %1082 = vmatprep.subr.bf16.mxu0 %v1179_v16  ;;  %v1208_v48 = vld [vmem:[%s1551_s1 + $0x120] sm:$0xff]   ;;  %v1210_v52 = vld [vmem:[%s1551_s1 + $0x128] sm:$0xff]   ;;  %v996_v53 = vcombine.high %v24_v51, %v24_v51  ;;  %v1218_v54 = vld [vmem:[%s1550_s0 + $0x18] ss:$0 sps:$4 sm:$0xff]  }
  0x11   :  { %1103 = vmatpush3.bf16.msra.mxu1 %v1178_v15  ;;  %v1215_v50 = vld [vmem:[%s1551_s1 + $0x180] sm:$0xff]   ;;  %v1211_v55 = vld [vmem:[%s1551_s1 + $0x170] sm:$0xff]  }
  0x12   :  { %1104 = vmatprep.subr.bf16.mxu1 %v1181_v18  ;;  %v1212_v56 = vld [vmem:[%s1551_s1 + $0x130] sm:$0xff]  }
  0x13   :  { %1083 = vmatpush3.bf16.msra.mxu0 %v1180_v17 }
  0x14   :  { %1084 = vmatprep.subr.bf16.mxu0 %v1183_v20 }
  0x15   :  { %1105 = vmatpush3.bf16.msra.mxu1 %v1182_v19 }
  0x16   :  { %1106 = vmatprep.subr.bf16.mxu1 %v1185_v22 }
  0x17   :  { %1085 = vmatpush3.bf16.msra.mxu0 %v1184_v21 }
  0x18   :  { %1086 = vmatprep.subr.bf16.mxu0 %v1187_v24 }
  0x19   :  { %1107 = vmatpush3.bf16.msra.mxu1 %v1186_v23 }
  0x1a   :  { %1108 = vmatprep.subr.bf16.mxu1 %v1189_v26 }
  0x1b   :  { %1087 = vmatpush3.bf16.msra.mxu0 %v1188_v25 }
  0x1c   :  { %1088 = vmatprep.subr.bf16.mxu0 %v1191_v28 }
  0x1d   :  { %1109 = vmatpush3.bf16.msra.mxu1 %v1190_v27 }
  0x1e   :  { %1110 = vmatprep.subr.bf16.mxu1 %v1193_v30 }
  0x1f   :  { %1089 = vmatpush3.bf16.msra.mxu0 %v1192_v29 }
  0x20   :  { %1118 = vmatprep.subr.bf16.mxu0 %v1197_v35 }
  0x21   :  { %1111 = vmatpush3.bf16.msra.mxu1 %v1196_v34 }
  0x22   :  { %486 = vmatmul.mubr.bf16.vlgmr.msra.gmra.mrb[0].mxu0 %v991_v32  ;;  %1145 = vmatprep.subr.bf16.mxu1 %v1291_v43 }
  0x23   :  { %1119 = vmatpush3.bf16.msra.mxu0 %v1200_v39  ;;  %565 = vmatprep.mubr.bf16.mxu0 %v996_v53 }
  0x24   :  { %526 = vmatmul.mubr.bf16.vlgmr.msra.gmra.mrb[0].mxu1 %v993_v37  ;;  %1120 = vmatprep.subr.bf16.mxu0 %v1201_v40 }
  0x25   :  { %1147 = vmatprep.mubr.msk.bf16.mxu1 %vm1292_vm0, %v1291_v43  ;;  %1146 = vmatpush3.bf16.msra.mxu1 %v1215_v50 }
  0x27   :  { %1121 = vmatpush3.bf16.msra.mxu0 %v1202_v41 }
  0x28   :  { %1122 = vmatprep.subr.bf16.mxu0 %v1203_v42 }
  0x2b   :  { %1123 = vmatpush3.bf16.msra.mxu0 %v1204_v44 }
  0x2c   :  { %1124 = vmatprep.subr.bf16.mxu0 %v1205_v45  ;;  %1148 = vmatmul.mubr.msk.bf16.vlgmr.msra.gmra.mrb[4].mxu1 %vm449_vm1, %v1218_v54 }
  0x2f   :  { %1125 = vmatpush3.bf16.msra.mxu0 %v1206_v46 }
  0x30   :  { %1126 = vmatprep.subr.bf16.mxu0 %v1207_v47 }
  0x33   :  { %1127 = vmatpush3.bf16.msra.mxu0 %v1208_v48 }
  0x34   :  { %1128 = vmatprep.subr.bf16.mxu0 %v1209_v49 }
  0x37   :  { %1129 = vmatpush3.bf16.msra.mxu0 %v1210_v52 }
  0x38   :  { %10 = vsyncpa [#allocation3], 0  ;;  %1130 = vmatprep.subr.bf16.mxu0 %v1211_v55  ;;  %v1213_v57 = vld [vmem:[%s1551_s1 + $0x178] sm:$0xff]   ;;  %v995_v59 = vcombine.low %v24_v51, %v24_v51  ;;  %v1221_v60 = vld [vmem:[%s1553_s3 + $0x4] ss:$28 sps:$4 sm:$0xff]   ;;  %v1293_v3 = vmov 0   ;;  %v633_v37 = vlaneseq }
  0x39   :  { %v1214_v58 = vld [vmem:[%s1551_s1 + $0x138] sm:$0xff]   ;;  %744 = vmatprep.subr.bf16.mxu1 %v1221_v60  ;;  %v1226_v1 = vld [vmem:[%s1553_s3 + $0x50] ss:$28 sps:$4 sm:$0xff]   ;;  %776 = vmatprep.mubr.bf16.mxu1 %v1293_v3  ;;  %v990_v5 = vld [vmem:[%s1552_s2] ss:$0 sm:$0xff]  ;;  %vm740_vm2 = vcmask 261120  }
  0x3a   :  { %v1219_v61 = vld [vmem:[%s1553_s3] ss:$28 sps:$4 sm:$0xff]   ;;  %v1222_v62 = vld [vmem:[%s1553_s3 + $0x18] ss:$28 sps:$4 sm:$0xff]   ;;  %v1229_v2 = vld [vmem:[%s1553_s3 + $0xc] ss:$28 sps:$4 sm:$0xff]  }
  0x3b   :  { %1131 = vmatpush3.bf16.msra.mxu0 %v1212_v56  ;;  %745 = vmatpush1.bf16.msra.mxu1 %v1219_v61  ;;  %v1225_v63 = vld [vmem:[%s1553_s3 + $0x3c] ss:$28 sps:$4 sm:$0xff]   ;;  %v1227_v29 = vld [vmem:[%s1553_s3 + $0x8] ss:$28 sps:$4 sm:$0xff]   ;;  %v1235_v33 = vld [vmem:[%s1553_s3 + $0x14] ss:$28 sps:$4 sm:$0xff]  }
  0x3c   :  { %1132 = vmatprep.subr.bf16.mxu0 %v1213_v57  ;;  %v1223_v0 = vld [vmem:[%s1553_s3 + $0x38] ss:$28 sps:$4 sm:$0xff]   ;;  %746 = vmatprep.subr.bf16.mxu1 %v1225_v63  ;;  %v1232_v31 = vld [vmem:[%s1553_s3 + $0x44] ss:$28 sps:$4 sm:$0xff]   ;;  %v1233_v34 = vld [vmem:[%s1553_s3 + $0x10] ss:$28 sps:$4 sm:$0xff]  }
  0x3d   :  { %v1230_v32 = vld [vmem:[%s1553_s3 + $0x40] ss:$28 sps:$4 sm:$0xff]   ;;  %v1238_v35 = vld [vmem:[%s1553_s3 + $0x4c] ss:$28 sps:$4 sm:$0xff]   ;;  %v634_v38 = vshrl.u32 %v633_v37, 7  ;;  %vm974_vm3 = vcmask 125952  }
  0x3e   :  { %v1236_v36 = vld [vmem:[%s1553_s3 + $0x48] ss:$28 sps:$4 sm:$0xff]   ;;  %s1294_s3 = smov [#allocation2]  }
  0x3f   :  { %1133 = vmatpush3.bf16.msra.mxu0 %v1214_v58  ;;  %747 = vmatpush1.bf16.msra.mxu1 %v1223_v0  ;;  %v635_v39 = vsub.s32 0, %v634_v38  ;;  %v659_v40 = vsub.s32 6, %v634_v38  ;;  %v631_v41 = vld [vmem:[%s1554_s4] sm:$0x7f]  ;;  %v639_v42 = vsub.s32 1, %v634_v38  ;;  %v643_v52 = vsub.s32 2, %v634_v38 }
  0x40   :  { %1151 = vmatprep.subr.bf16.mxu0 %v1291_v43  ;;  %785 = vmatprep.subr.bf16.mxu1 %v1229_v2  ;;  %v647_v56 = vsub.s32 3, %v634_v38  ;;  %s982_s4 = sshll.u32 %s1294_s3, 4  ;;  %s983_s4 = int_to_ptr.vmem [resolvable:$true] %s982_s4 }
  0x41   :  { %v660_v44 = vrot.slane %v631_v41, %v659_v40  ;;  %v640_v45 = vrot.slane %v631_v41, %v639_v42  ;;  %v644_v0 = vrot.slane %v631_v41, %v643_v52  ;;  %s1267_s27 = scalar_lea.vmem %s983_s4, 448  ;;  %p1272_p1 = scmp.lt.s32.totalorder %s983_s4, %s983_s4 }
  0x42   :  { %566 = vmatmul.mubr.bf16.vlgmr.msra.gmra.mrb[4].mxu0 %v995_v59  ;;  %v648_v2 = vrot.slane %v631_v41, %v647_v56  ;;  %p1268_p0 = scmp.ne.s32.totalorder %s983_s4, %s1267_s27  ;;  %p1273_p2 = scmp.lt.s32.totalorder %s1267_s27, %s1267_s27 }
  0x43   :  { %1155 = vmatprep.mubr.msk.bf16.mxu0 %vm1292_vm0, %v1291_v43  ;;  %1152 = vmatpush3.bf16.msra.mxu0 %v1222_v62 }
  0x44   :  { %1153 = vmatprep.subr.bf16.mxu0 %v1291_v43  ;;  %v636_v43 = vrot.slane %v631_v41, %v635_v39  ;;  %p1274_p3 = por %p1273_p2, %p1272_p1 }
  0x46   :  { %p1275_p4 = pnand %p1274_p3, %p1268_p0 }
  0x47   :  { %1154 = vmatpush3.bf16.msra.mxu0 %v1226_v1 }
  0xf5   :  { %v1090_v4 = vpop.f32.mrb[0].mxu0 }
  0xf6   :  { %v1091_v6 = vpop.f32.mrb[1].mxu0 }
  0xf7   :  { %v1092_v7 = vadd.f32 %v1091_v6, %v1090_v4  ;;  %v1093_v8 = vpop.f32.mrb[2].mxu0  ;;  %v1112_v9 = vpop.f32.mrb[0].mxu1  ;;  %v651_v6 = vsub.s32 4, %v634_v38 }
  0xf8   :  { %v1094_v10 = vpop.f32.mrb[3].mxu0  ;;  %v1113_v11 = vpop.f32.mrb[1].mxu1 }
  0xf9   :  { %v488_v12 = vadd.f32 %v1092_v7, %v990_v5  ;;  %v1114_v13 = vadd.f32 %v1113_v11, %v1112_v9  ;;  %v1115_v14 = vpop.f32.mrb[2].mxu1  ;;  %v655_v9 = vsub.s32 5, %v634_v38 }
  0xfa   :  { %v1116_v15 = vpop.f32.mrb[3].mxu1  ;;  %v652_v14 = vrot.slane %v631_v41, %v651_v6 }
  0xfb   :  { %v528_v16 = vadd.f32 %v1114_v13, %v488_v12 }
  0xff   :  { %v607_v17 = vpop.f32.mrb[4].mxu1 }
 0x100   :  { %v1149_v18 = vpop.f32.mrb[5].mxu1 }
 0x101   :  { %v610_v19 = vpop.f32.mrb[6].mxu1 }
 0x102   :  { %v1150_v20 = vpop.f32.mrb[7].mxu1 }
 0x115   :  { %v1134_v21 = vpop.f32.mrb[4].mxu0 }
 0x116   :  { %v1135_v22 = vpop.f32.mrb[5].mxu0 }
 0x117   :  { %v1136_v23 = vadd.f32 %v1135_v22, %v1134_v21  ;;  %v1137_v24 = vpop.f32.mrb[6].mxu0 }
 0x118   :  { %v1138_v25 = vpop.f32.mrb[7].mxu0 }
 0x119   :  { %v568_v26 = vadd.f32 %v1136_v23, %v528_v16  ;;  %v656_v16 = vrot.slane %v631_v41, %v655_v9 }
 0x11b   :  { %v608_v27 = vadd.f32 %v607_v17, %v568_v26 }
 0x11d   :  { %v613_v28 = vmax.f32 %v608_v27, 0.0 }
 0x11f   :  { %v614_v30 = vpack.c.bf16 %v613_v28, %v613_v28 }
 0x121   :  { %1062 = vmatmul.mubr.msk.bf16.vlgmr.msra.gmra.mrb[8].mxu1 %vm740_vm2, %v614_v30  ;;  %1156 = vmatmul.mubr.msk.bf16.vlgmr.msra.gmra.mrb[8].mxu0 %vm740_vm2, %v614_v30 }
 0x122   :  { %786 = vmatpush1.bf16.msra.mxu1 %v1227_v29  ;;  %817 = vmatprep.mubr.bf16.mxu1 %v1293_v3 }
 0x123   :  { %787 = vmatprep.subr.bf16.mxu1 %v1232_v31 }
 0x126   :  { %788 = vmatpush1.bf16.msra.mxu1 %v1230_v32 }
 0x127   :  { %826 = vmatprep.subr.bf16.mxu1 %v1235_v33 }
 0x129   :  { %1063 = vmatmul.mubr.msk.bf16.vlgmr.msra.gmra.mrb[12].mxu1 %vm740_vm2, %v614_v30 }
 0x12a   :  { %827 = vmatpush1.bf16.msra.mxu1 %v1233_v34  ;;  %858 = vmatprep.mubr.bf16.mxu1 %v1293_v3 }
 0x12b   :  { %828 = vmatprep.subr.bf16.mxu1 %v1238_v35 }
 0x12e   :  { %829 = vmatpush1.bf16.msra.mxu1 %v1236_v36 }
 0x131   :  { %1064 = vmatmul.mubr.msk.bf16.vlgmr.msra.gmra.mrb[16].mxu1 %vm740_vm2, %v614_v30 }
 0x1f4   :  { %v778_v46 = vpop.f32.mrb[8].mxu1  ;;  %v901_v47 = vpop.f32.mrb[8].mxu0 }
 0x1f5   :  { %v779_v48 = vadd.f32 %v778_v46, %v636_v43  ;;  %v902_v49 = vadd.f32 %v901_v47, %v660_v44  ;;  %v780_v50 = vpop.f32.mrb[9].mxu1  ;;  %v1157_v51 = vpop.f32.mrb[9].mxu0 }
 0x1f6   :  { %v781_v53 = vadd.f32 %v780_v50, %v640_v45  ;;  %v782_v54 = vpop.f32.mrb[10].mxu1  ;;  %v904_v55 = vpop.f32.mrb[10].mxu0 }
 0x1f7   :  { %v907_v57 = vsub.f32 0.0, %v779_v48  ;;  %v913_v58 = vsub.f32 0.0, %v902_v49  ;;  %v783_v59 = vpop.f32.mrb[11].mxu1  ;;  %v1158_v60 = vpop.f32.mrb[11].mxu0 }
 0x1f8   :  { %v908_v61 = vsub.f32 0.0, %v781_v53 }
 0x1f9   :  { %v914_v62 = vmul.f32 1.442695, %v907_v57  ;;  %v926_v63 = vmul.f32 1.442695, %v913_v58 }
 0x1fa   :  { %v916_v1 = vmul.f32 1.442695, %v908_v61 }
 0x1fb   :  { %1239 = vpow2.f32 %v914_v62 }
 0x1fc   :  { %1241 = vpow2.f32 %v926_v63  ;;  %v819_v3 = vpop.f32.mrb[12].mxu1 }
 0x1fd   :  { %1243 = vpow2.f32 %v916_v1  ;;  %v820_v4 = vadd.f32 %v819_v3, %v644_v0  ;;  %v821_v5 = vpop.f32.mrb[13].mxu1 }
 0x1fe   :  { %v822_v7 = vadd.f32 %v821_v5, %v648_v2  ;;  %v823_v8 = vpop.f32.mrb[14].mxu1 }
 0x1ff   :  { %v909_v10 = vsub.f32 0.0, %v820_v4  ;;  %v824_v11 = vpop.f32.mrb[15].mxu1 }
 0x200   :  { %v910_v12 = vsub.f32 0.0, %v822_v7 }
 0x201   :  { %v918_v13 = vmul.f32 1.442695, %v909_v10 }
 0x202   :  { %v920_v15 = vmul.f32 1.442695, %v910_v12 }
 0x203   :  { %1245 = vpow2.f32 %v918_v13 }
 0x204   :  { %1247 = vpow2.f32 %v920_v15  ;;  %v860_v17 = vpop.f32.mrb[16].mxu1 }
 0x205   :  { %v1240_v18 = vpop.eup %1239  ;;  %v861_v19 = vadd.f32 %v860_v17, %v652_v14  ;;  %v862_v20 = vpop.f32.mrb[17].mxu1 }
 0x206   :  { %v1242_v21 = vpop.eup %1241  ;;  %v928_v22 = vadd.f32 1.0, %v1240_v18  ;;  %v863_v23 = vadd.f32 %v862_v20, %v656_v16  ;;  %v864_v24 = vpop.f32.mrb[18].mxu1 }
 0x207   :  { %v1244_v25 = vpop.eup %1243  ;;  %v934_v26 = vadd.f32 1.0, %v1242_v21  ;;  %v911_v27 = vsub.f32 0.0, %v861_v19  ;;  %v865_v28 = vpop.f32.mrb[19].mxu1 }
 0x208   :  { %1249 = vrcp.f32 %v928_v22  ;;  %v929_v29 = vadd.f32 1.0, %v1244_v25  ;;  %v912_v30 = vsub.f32 0.0, %v863_v23 }
 0x209   :  { %1251 = vrcp.f32 %v934_v26  ;;  %v922_v31 = vmul.f32 1.442695, %v911_v27 }
 0x20a   :  { %1253 = vrcp.f32 %v929_v29  ;;  %v924_v32 = vmul.f32 1.442695, %v912_v30 }
 0x20b   :  { %1255 = vpow2.f32 %v922_v31 }
 0x20c   :  { %1257 = vpow2.f32 %v924_v32 }
 0x20d   :  { %v1246_v33 = vpop.eup %1245 }
 0x20e   :  { %v1248_v34 = vpop.eup %1247  ;;  %v930_v35 = vadd.f32 1.0, %v1246_v33 }
 0x20f   :  { %v931_v36 = vadd.f32 1.0, %v1248_v34 }
 0x210   :  { %1259 = vrcp.f32 %v930_v35 }
 0x211   :  { %1261 = vrcp.f32 %v931_v36 }
 0x212   :  { %v1250_v37 = vpop.eup %1249 }
 0x213   :  { %v1252_v38 = vpop.eup %1251 }
 0x214   :  { %v1254_v39 = vpop.eup %1253  ;;  %v1073_v40 = vpack.c.bf16 %v1252_v38, %v1252_v38 }
 0x215   :  { %v1256_v41 = vpop.eup %1255  ;;  %v1070_v42 = vpack.c.bf16 %v1254_v39, %v1250_v37 }
 0x216   :  { %v1258_v43 = vpop.eup %1257  ;;  %v932_v44 = vadd.f32 1.0, %v1256_v41  ;;  %975 = vst.msk [vmem:[#allocation2 + $0x18] sm:$0xf] %vm974_vm3, %v1073_v40 }
 0x217   :  { %v933_v45 = vadd.f32 1.0, %v1258_v43  ;;  %971 = vst [vmem:[#allocation2] sm:$0xff] %v1070_v42 }
 0x218   :  { %1263 = vrcp.f32 %v932_v44 }
 0x219   :  { %1265 = vrcp.f32 %v933_v45 }
 0x21a   :  { %v1260_v46 = vpop.eup %1259 }
 0x21b   :  { %v1262_v47 = vpop.eup %1261 }
 0x21c   :  { %v1071_v48 = vpack.c.bf16 %v1262_v47, %v1260_v46 }
 0x21e   :  { %972 = vst [vmem:[#allocation2 + $0x8] sm:$0xff] %v1071_v48 }
 0x222   :  { %v1264_v49 = vpop.eup %1263 }
 0x223   :  { %v1266_v50 = vpop.eup %1265 }
 0x224   :  { %v1072_v51 = vpack.c.bf16 %v1266_v50, %v1264_v49 }
 0x226   :  { %973 = vst [vmem:[#allocation2 + $0x10] sm:$0xff] %v1072_v51 }
 0x227   :  { %1278 = shalt.err (!%p1275_p4)
}
 0x228   :  { %s1279_s29 = scalar_lea.hbm %s1555_s5, 448 }
 0x229   :  { %p1280_p5 = scmp.ne.s32.totalorder %s1555_s5, %s1279_s29  ;;  %p1283_p6 = scmp.lt.u32.totalorder %s1279_s29, %s1555_s5 }
 0x22b   :  { %p1285_p7 = pnand %p1283_p6, %p1280_p5 }
 0x22d   :  { %1288 = shalt.err (!%p1285_p7)
}
 0x22e   :  { %985 = dma.vmem_to_hbm [thread:$0]  %s983_s4, 448, %s1555_s5, [#allocation3]  }
 0x22f   :  { %1289 = dma.done.wait [#allocation3], 448  }
 0x230   :  { %1290 = vsyncadd [#allocation3], 4294966848 }
 0x231   :  { %989 = vsyncpa [#allocation3], 1 }

</bundles_post_ra>
